<compile_context>
chip_gen: v6e
topology: v6e:2x2x1
jax: 0.10.0
libtpu: 0.0.40
codegen_flags: <defaults>
</compile_context>

<pallas_src>
import jax
import jax.numpy as jnp
from jax.experimental import pallas as pl
from jax.experimental.pallas import tpu as pltpu

LANE = 128            # lane width; batch tiles are kept multiples of this
H1, H2 = 128, 64      # hidden sizes
DEFAULT_TB = 2048     # default batch tile (rows per grid step)


def _round_up(n, m):
    return ((n + m - 1) // m) * m


def _vmem_capacity_bytes():
    """Physical VMEM per TensorCore; conservative fallback = v7x (64 MiB)."""
    try:
        return int(pltpu.get_tpu_info().vmem_capacity_bytes)
    except Exception:
        return 64 * 1024 * 1024


def critic_kernel(x_ref, w1_ref, b1_ref, w2_ref, b2_ref, w3_ref, b3_ref, o_ref):
    x = x_ref[...]
    # fc1 + ReLU  (x / w1 may be bf16; accumulation is always f32 on the MXU)
    h1 = jnp.dot(x, w1_ref[...], preferred_element_type=jnp.float32) + b1_ref[...]
    h1 = jnp.maximum(h1, 0.0)
    # fc2 + ReLU
    h2 = jnp.dot(h1, w2_ref[...], preferred_element_type=jnp.float32) + b2_ref[...]
    h2 = jnp.maximum(h2, 0.0)
    # fc3 (value head) — true (64, 1) weight; narrow [TB, 1] store.
    v = jnp.dot(h2, w3_ref[...], preferred_element_type=jnp.float32) + b3_ref[...]
    o_ref[...] = v.astype(o_ref.dtype)


def critic_forward(x, params, *, tb=DEFAULT_TB):
    """x: [B, input_dim] (float32 or bfloat16)  ->  value estimate [B, 1] float32."""
    w1, b1, w2, b2, w3, b3 = params
    B, input_dim = x.shape

    # Stream fc1 in the input dtype (e.g. bf16 to halve HBM read traffic on
    # v5e/v6e/v7x); the cast of w1 is tiny and only happens when dtypes differ.
    if w1.dtype != x.dtype:
        w1 = w1.astype(x.dtype)

    itemsize = jnp.dtype(x.dtype).itemsize
    bytes_per_row = itemsize * input_dim + 4          # x row in + one f32 value out

    # --- generation-aware streaming budget for the double-buffered x/out tiles ---
    capacity = _vmem_capacity_bytes()
    stream_budget = min(32 * 1024 * 1024, max(8 * 1024 * 1024, capacity // 3))
    max_rows = max(LANE, (stream_budget // (2 * bytes_per_row)) // LANE * LANE)

    tb_eff = min(tb, max_rows, _round_up(B, LANE))
    if B >= 2 * LANE:
        # Guarantee >= 2 grid steps so both v7x TensorCores get work.
        tb_eff = min(tb_eff, _round_up(pl.cdiv(B, 2), LANE))
    tb_eff = max(LANE, (tb_eff // LANE) * LANE)

    grid = (pl.cdiv(B, tb_eff),)                      # ragged last block is masked

    # --- VMEM limit: double-buffered tiles + resident weights + headroom ---
    weight_bytes = sum(int(p.size) * jnp.dtype(p.dtype).itemsize
                       for p in (w1, b1, w2, b2, w3, b3))
    needed = 2 * tb_eff * bytes_per_row + 2 * weight_bytes
    cap = min(capacity * 3 // 4, 96 * 1024 * 1024)    # <= 48 MiB on v7x
    vmem_limit = int(min(max(needed + 8 * 1024 * 1024, 32 * 1024 * 1024), cap))

    # Advisory cost hint (kept in sync with the narrow output / actual dtypes).
    flops = 2 * B * (input_dim * H1 + H1 * H2 + H2 * 1)
    bytes_accessed = B * itemsize * input_dim + B * 4 + weight_bytes
    cost = pl.CostEstimate(flops=flops, transcendentals=0,
                           bytes_accessed=bytes_accessed)

    const = lambda i: (0, 0)   # weights/biases resident across all grid steps

    out = pl.pallas_call(
        critic_kernel,
        out_shape=jax.ShapeDtypeStruct((B, 1), jnp.float32),
        grid=grid,
        in_specs=[
            pl.BlockSpec((tb_eff, input_dim), lambda i: (i, 0)),  # x: batch-blocked
            pl.BlockSpec((input_dim, H1), const),                 # w1
            pl.BlockSpec((1, H1), const),                         # b1
            pl.BlockSpec((H1, H2), const),                        # w2
            pl.BlockSpec((1, H2), const),                         # b2
            pl.BlockSpec((H2, 1), const),                         # w3
            pl.BlockSpec((1, 1), const),                          # b3
        ],
        out_specs=pl.BlockSpec((tb_eff, 1), lambda i: (i, 0)),    # narrow output
        compiler_params=pltpu.CompilerParams(
            dimension_semantics=("parallel",),   # batch steps shard across v7x TCs
            vmem_limit_bytes=vmem_limit,
        ),
        cost_estimate=cost,
    )(x, w1, b1, w2, b2, w3, b3)

    return out


def xavier_uniform(key, fan_in, fan_out):
    bound = jnp.sqrt(6.0 / (fan_in + fan_out))
    # stored [in, out] (transpose of PyTorch's [out, in]; same init distribution)
    return jax.random.uniform(key, (fan_in, fan_out), jnp.float32, -bound, bound)


def init_params(key, input_dim):
    k1, k2, k3 = jax.random.split(key, 3)
    w1 = xavier_uniform(k1, input_dim, H1)
    b1 = jnp.zeros((1, H1), jnp.float32)
    w2 = xavier_uniform(k2, H1, H2)
    b2 = jnp.zeros((1, H2), jnp.float32)
    w3 = xavier_uniform(k3, H2, 1)
    b3 = jnp.zeros((1, 1), jnp.float32)
    return (w1, b1, w2, b2, w3, b3)


def reference_forward(x, params):
    """Plain-JAX reference of the PyTorch forward pass (always f32)."""
    w1, b1, w2, b2, w3, b3 = params
    x = x.astype(jnp.float32)
    h1 = jnp.maximum(x @ w1 + b1, 0.0)
    h2 = jnp.maximum(h1 @ w2 + b2, 0.0)
    return h2 @ w3 + b3


if __name__ == "__main__":
    key = jax.random.PRNGKey(0)
    k_param, k_x1, k_x2 = jax.random.split(key, 3)

    input_dim = 32
    params = init_params(k_param, input_dim)

    # Case 1: tiny batch -> single partial block (masked read + masked write).
    x_small = jax.random.normal(k_x1, (8, input_dim), jnp.float32)
    out_small = jax.block_until_ready(critic_forward(x_small, params))
    ref_small = reference_forward(x_small, params)
    assert out_small.shape == (8, 1)
    assert jnp.allclose(out_small, ref_small, atol=1e-5, rtol=1e-5)

    # Case 2: multi-step grid, B not a multiple of the tile (ragged last block,
    # exercises the no-pad cdiv path and >=2 grid steps for megacore).
    x_big = jax.random.normal(k_x2, (300, input_dim), jnp.float32)
    out_big = jax.block_until_ready(critic_forward(x_big, params, tb=128))
    ref_big = reference_forward(x_big, params)
    assert out_big.shape == (300, 1)
    assert jnp.allclose(out_big, ref_big, atol=1e-5, rtol=1e-5)

    # Case 3: bf16 streaming of x (fc1 runs bf16 on the MXU, f32 accumulation).
    # Looser tolerance vs. the f32 reference because the inputs are rounded.
    out_bf16 = jax.block_until_ready(
        critic_forward(x_big.astype(jnp.bfloat16), params, tb=128))
    assert out_bf16.shape == (300, 1)
    assert jnp.allclose(out_bf16, ref_big, atol=1e-1, rtol=1e-1)

    print("KERNEL_OK")
</pallas_src>

<mosaic_0001>
module attributes {stable_mosaic.version = 11 : i64} {
  func.func @critic_kernel(%arg0: i32, %arg1: memref<128x32xf32, #tpu.memory_space<vmem>>, %arg2: memref<32x128xf32, #tpu.memory_space<vmem>>, %arg3: memref<1x128xf32, #tpu.memory_space<vmem>>, %arg4: memref<128x64xf32, #tpu.memory_space<vmem>>, %arg5: memref<1x64xf32, #tpu.memory_space<vmem>>, %arg6: memref<64x1xf32, #tpu.memory_space<vmem>>, %arg7: memref<1x1xf32, #tpu.memory_space<vmem>>, %arg8: memref<128x1xf32, #tpu.memory_space<vmem>>) attributes {dimension_semantics = [#tpu.dimension_semantics<parallel>], iteration_bounds = array<i64: 1>, scalar_prefetch = 0 : i64, scratch_operands = 0 : i64, tpu.core_type = #tpu.core_type<tc>, window_params = [{transform_indices = @transform_0, window_bounds = array<i64: 128, 32>}, {pipeline_mode = #tpu.pipeline_mode<synchronous>, transform_indices = @transform_1, window_bounds = array<i64: 32, 128>}, {pipeline_mode = #tpu.pipeline_mode<synchronous>, transform_indices = @transform_2, window_bounds = array<i64: 1, 128>}, {pipeline_mode = #tpu.pipeline_mode<synchronous>, transform_indices = @transform_3, window_bounds = array<i64: 128, 64>}, {pipeline_mode = #tpu.pipeline_mode<synchronous>, transform_indices = @transform_4, window_bounds = array<i64: 1, 64>}, {pipeline_mode = #tpu.pipeline_mode<synchronous>, transform_indices = @transform_5, window_bounds = array<i64: 64, 1>}, {pipeline_mode = #tpu.pipeline_mode<synchronous>, transform_indices = @transform_6, window_bounds = array<i64: 1, 1>}, {transform_indices = @transform_7, window_bounds = array<i64: 128, 1>}]} {
    %c0 = arith.constant 0 : index
    %c0_0 = arith.constant 0 : index
    %0 = vector.load %arg1[%c0, %c0_0] : memref<128x32xf32, #tpu.memory_space<vmem>>, vector<128x32xf32>
    %c0_1 = arith.constant 0 : index
    %c0_2 = arith.constant 0 : index
    %1 = vector.load %arg2[%c0_1, %c0_2] : memref<32x128xf32, #tpu.memory_space<vmem>>, vector<32x128xf32>
    %cst = arith.constant dense<0.000000e+00> : vector<128x128xf32>
    %2 = tpu.matmul %0, %1, %cst {dimension_numbers = #tpu.dot_dimension_numbers<[1], [0], [0], [1], [0, 0, 1, 1], [], []>} : vector<128x32xf32>, vector<32x128xf32>, vector<128x128xf32> -> vector<128x128xf32>
    %c0_3 = arith.constant 0 : index
    %c0_4 = arith.constant 0 : index
    %3 = vector.load %arg3[%c0_3, %c0_4] : memref<1x128xf32, #tpu.memory_space<vmem>>, vector<1x128xf32>
    %4 = vector.broadcast %3 : vector<1x128xf32> to vector<128x128xf32>
    %5 = arith.addf %2, %4 : vector<128x128xf32>
    %cst_5 = arith.constant 0.000000e+00 : f32
    %6 = vector.broadcast %cst_5 : f32 to vector<128x128xf32>
    %7 = arith.maximumf %5, %6 : vector<128x128xf32>
    %c0_6 = arith.constant 0 : index
    %c0_7 = arith.constant 0 : index
    %8 = vector.load %arg4[%c0_6, %c0_7] : memref<128x64xf32, #tpu.memory_space<vmem>>, vector<128x64xf32>
    %cst_8 = arith.constant dense<0.000000e+00> : vector<128x64xf32>
    %9 = tpu.matmul %7, %8, %cst_8 {dimension_numbers = #tpu.dot_dimension_numbers<[1], [0], [0], [1], [0, 0, 1, 1], [], []>} : vector<128x128xf32>, vector<128x64xf32>, vector<128x64xf32> -> vector<128x64xf32>
    %c0_9 = arith.constant 0 : index
    %c0_10 = arith.constant 0 : index
    %10 = vector.load %arg5[%c0_9, %c0_10] : memref<1x64xf32, #tpu.memory_space<vmem>>, vector<1x64xf32>
    %11 = vector.broadcast %10 : vector<1x64xf32> to vector<128x64xf32>
    %12 = arith.addf %9, %11 : vector<128x64xf32>
    %cst_11 = arith.constant 0.000000e+00 : f32
    %13 = vector.broadcast %cst_11 : f32 to vector<128x64xf32>
    %14 = arith.maximumf %12, %13 : vector<128x64xf32>
    %c0_12 = arith.constant 0 : index
    %c0_13 = arith.constant 0 : index
    %15 = vector.load %arg6[%c0_12, %c0_13] : memref<64x1xf32, #tpu.memory_space<vmem>>, vector<64x1xf32>
    %cst_14 = arith.constant dense<0.000000e+00> : vector<128x1xf32>
    %16 = tpu.matmul %14, %15, %cst_14 {dimension_numbers = #tpu.dot_dimension_numbers<[1], [0], [0], [1], [0, 0, 1, 1], [], []>} : vector<128x64xf32>, vector<64x1xf32>, vector<128x1xf32> -> vector<128x1xf32>
    %c0_15 = arith.constant 0 : index
    %c0_16 = arith.constant 0 : index
    %17 = vector.load %arg7[%c0_15, %c0_16] : memref<1x1xf32, #tpu.memory_space<vmem>>, vector<1x1xf32>
    %18 = vector.broadcast %17 : vector<1x1xf32> to vector<128x1xf32>
    %19 = arith.addf %16, %18 : vector<128x1xf32>
    %c0_17 = arith.constant 0 : index
    %c0_18 = arith.constant 0 : index
    %20 = vector.load %arg8[%c0_17, %c0_18] : memref<128x1xf32, #tpu.memory_space<vmem>>, vector<128x1xf32>
    tpu.vector_store %arg8[%c0_17, %c0_18], %19 {strides = array<i32>} : memref<128x1xf32, #tpu.memory_space<vmem>>, vector<128x1xf32>,
    return
  }
  func.func @transform_0(%arg0: i32) -> (i32, i32) {
    %c0_i32 = arith.constant 0 : i32
    %c0_i32_0 = arith.constant 0 : i32
    return %arg0, %c0_i32 : i32, i32
  }
  func.func @transform_1(%arg0: i32) -> (i32, i32) {
    %c0_i32 = arith.constant 0 : i32
    %c0_i32_0 = arith.constant 0 : i32
    %c0_i32_1 = arith.constant 0 : i32
    return %c0_i32, %c0_i32_0 : i32, i32
  }
  func.func @transform_2(%arg0: i32) -> (i32, i32) {
    %c0_i32 = arith.constant 0 : i32
    %c0_i32_0 = arith.constant 0 : i32
    %c0_i32_1 = arith.constant 0 : i32
    return %c0_i32, %c0_i32_0 : i32, i32
  }
  func.func @transform_3(%arg0: i32) -> (i32, i32) {
    %c0_i32 = arith.constant 0 : i32
    %c0_i32_0 = arith.constant 0 : i32
    %c0_i32_1 = arith.constant 0 : i32
    return %c0_i32, %c0_i32_0 : i32, i32
  }
  func.func @transform_4(%arg0: i32) -> (i32, i32) {
    %c0_i32 = arith.constant 0 : i32
    %c0_i32_0 = arith.constant 0 : i32
    %c0_i32_1 = arith.constant 0 : i32
    return %c0_i32, %c0_i32_0 : i32, i32
  }
  func.func @transform_5(%arg0: i32) -> (i32, i32) {
    %c0_i32 = arith.constant 0 : i32
    %c0_i32_0 = arith.constant 0 : i32
    %c0_i32_1 = arith.constant 0 : i32
    return %c0_i32, %c0_i32_0 : i32, i32
  }
  func.func @transform_6(%arg0: i32) -> (i32, i32) {
    %c0_i32 = arith.constant 0 : i32
    %c0_i32_0 = arith.constant 0 : i32
    %c0_i32_1 = arith.constant 0 : i32
    return %c0_i32, %c0_i32_0 : i32, i32
  }
  func.func @transform_7(%arg0: i32) -> (i32, i32) {
    %c0_i32 = arith.constant 0 : i32
    %c0_i32_0 = arith.constant 0 : i32
    return %arg0, %c0_i32 : i32, i32
  }
}

</mosaic_0001>

<bundles_post_ra>
// kernel: tpu_custom_call.1
= control target key start
LH: loop header
LB: loop body
LE: loop exit
PB: predicated region body
PF: predicated region fallthrough
CT: control target
= control target key end

     0   :  { %s1205_s0 = inlined_call_operand.vmem [shape: f32[8,32], index: 0, kind: input, shape index: {}]   ;;  %s1206_s1 = inlined_call_operand.vmem [shape: f32[32,128], index: 1, kind: input, shape index: {}]   ;;  %s1207_s2 = inlined_call_operand.vmem [shape: f32[1,128], index: 2, kind: input, shape index: {}]   ;;  %s1208_s3 = inlined_call_operand.vmem [shape: f32[128,64], index: 3, kind: input, shape index: {}]   ;;  %s1209_s4 = inlined_call_operand.vmem [shape: f32[1,64], index: 4, kind: input, shape index: {}]   ;;  %s1210_s5 = inlined_call_operand.vmem [shape: f32[64,1], index: 5, kind: input, shape index: {}]   ;;  %s1211_s6 = inlined_call_operand.<no memory space> [shape: f32[1,1], index: 6, kind: input, shape index: {}]   ;;  %s1212_s7 = inlined_call_operand.vmem [shape: f32[8,1], index: 7, kind: output, shape index: {}]  }
   0x1   :  { %v12_v0 = vstv %s1211_s6 }
   0x2   :  { %13 = vst [vmem:[#allocation2] sm:$0x1] %v12_v0 }
   0x3   :  { %v47_v1 = vld [vmem:[%s1206_s1 + $0x18] sm:$0xff]  ;;  %v46_v2 = vld [vmem:[%s1206_s1 + $0x10] sm:$0xff]  ;;  %vm55_vm0 = vcmask 261120   ;;  %v28_v3 = vld [vmem:[%s1205_s0] sm:$0xff]  ;;  %vm464_vm1 = vcmask 523264   ;;  %vm658_vm2 = vcmask 7168  }
   0x4   :  { %827 = vmatprep.subr.mxu0 %v47_v1  ;;  %v45_v4 = vld [vmem:[%s1206_s1 + $0x8] sm:$0xff]  ;;  %835 = vmatprep.mubr.msk.f32.mxu0 %vm55_vm0, %v28_v3  ;;  %v44_v5 = vld [vmem:[%s1206_s1] sm:$0xff]  ;;  %v280_v7 = vld [vmem:[%s1208_s3 + $0x78] sm:$0xff] }
   0x5   :  { %828 = vmatpush3.msra.mxu0 %v47_v1  ;;  %v29_v6 = vld [vmem:[%s1205_s0 + $0x8] sm:$0xff]  ;;  %v30_v8 = vld [vmem:[%s1205_s0 + $0x10] sm:$0xff]  ;;  %859 = vmatprep.subr.mxu1 %v280_v7  ;;  %v31_v11 = vld [vmem:[%s1205_s0 + $0x18] sm:$0xff] }
   0x6   :  { %829 = vmatprep.subr.mxu0 %v46_v2  ;;  %v279_v9 = vld [vmem:[%s1208_s3 + $0x70] sm:$0xff]  ;;  %860 = vmatpush3.msra.mxu1 %v280_v7  ;;  %v278_v10 = vld [vmem:[%s1208_s3 + $0x68] sm:$0xff]  ;;  %v277_v12 = vld [vmem:[%s1208_s3 + $0x60] sm:$0xff] }
   0x7   :  { %830 = vmatpush3.msra.mxu0 %v46_v2  ;;  %861 = vmatprep.subr.mxu1 %v279_v9  ;;  %v32_v13 = vld [vmem:[%s1205_s0 + $0x20] sm:$0xff]  ;;  %v276_v14 = vld [vmem:[%s1208_s3 + $0x58] sm:$0xff]  ;;  %v33_v15 = vld [vmem:[%s1205_s0 + $0x28] sm:$0xff] }
   0x8   :  { %831 = vmatprep.subr.mxu0 %v45_v4  ;;  %862 = vmatpush3.msra.mxu1 %v279_v9  ;;  %v275_v16 = vld [vmem:[%s1208_s3 + $0x50] sm:$0xff]  ;;  %v274_v18 = vld [vmem:[%s1208_s3 + $0x48] sm:$0xff]  ;;  %v35_v19 = vld [vmem:[%s1205_s0 + $0x38] sm:$0xff] }
   0x9   :  { %832 = vmatpush3.msra.mxu0 %v45_v4  ;;  %863 = vmatprep.subr.mxu1 %v278_v10  ;;  %v34_v17 = vld [vmem:[%s1205_s0 + $0x30] sm:$0xff]  ;;  %v273_v20 = vld [vmem:[%s1208_s3 + $0x40] sm:$0xff]  ;;  %v272_v22 = vld [vmem:[%s1208_s3 + $0x38] sm:$0xff] }
   0xa   :  { %833 = vmatprep.subr.mxu0 %v44_v5  ;;  %864 = vmatpush3.msra.mxu1 %v278_v10  ;;  %v36_v21 = vld [vmem:[%s1205_s0 + $0x40] sm:$0xff]  ;;  %v37_v23 = vld [vmem:[%s1205_s0 + $0x48] sm:$0xff]  ;;  %v271_v24 = vld [vmem:[%s1208_s3 + $0x30] sm:$0xff] }
   0xb   :  { %834 = vmatpush3.msra.mxu0 %v44_v5  ;;  %865 = vmatprep.subr.mxu1 %v277_v12  ;;  %v38_v25 = vld [vmem:[%s1205_s0 + $0x50] sm:$0xff]  ;;  %v270_v26 = vld [vmem:[%s1208_s3 + $0x28] sm:$0xff]  ;;  %v39_v27 = vld [vmem:[%s1205_s0 + $0x58] sm:$0xff] }
   0xc   :  { %836 = vmatmul.mubr.msk.f32.vlgmr.msra.gmra.mxu0 %vm55_vm0, %v29_v6  ;;  %866 = vmatpush3.msra.mxu1 %v277_v12  ;;  %v269_v28 = vld [vmem:[%s1208_s3 + $0x20] sm:$0xff]  ;;  %v41_v30 = vld [vmem:[%s1205_s0 + $0x68] sm:$0xff]  ;;  %v42_v31 = vld [vmem:[%s1205_s0 + $0x70] sm:$0xff] }
   0xd   :  { %838 = vmatprep.mubr.msk.f32.mxu0 %vm55_vm0, %v30_v8  ;;  %867 = vmatprep.subr.mxu1 %v276_v14  ;;  %v40_v29 = vld [vmem:[%s1205_s0 + $0x60] sm:$0xff]  ;;  %v43_v32 = vld [vmem:[%s1205_s0 + $0x78] sm:$0xff]  ;;  %v267_v34 = vld [vmem:[%s1208_s3 + $0x10] sm:$0xff] }
   0xe   :  { %868 = vmatpush3.msra.mxu1 %v276_v14  ;;  %v268_v33 = vld [vmem:[%s1208_s3 + $0x18] sm:$0xff]  ;;  %v266_v35 = vld [vmem:[%s1208_s3 + $0x8] sm:$0xff]  ;;  %v265_v36 = vld [vmem:[%s1208_s3] sm:$0xff] }
   0xf   :  { %869 = vmatprep.subr.mxu1 %v275_v16  ;;  %v456_v37 = vld [vmem:[%s1210_s5 + $0x38] sm:$0xff]  ;;  %v455_v38 = vld [vmem:[%s1210_s5 + $0x30] sm:$0xff]  ;;  %v454_v39 = vld [vmem:[%s1210_s5 + $0x28] sm:$0xff] }
  0x10   :  { %839 = vmatmul.mubr.msk.f32.gmra.mxu0 %vm55_vm0, %v31_v11  ;;  %870 = vmatpush3.msra.mxu1 %v275_v16  ;;  %v453_v40 = vld [vmem:[%s1210_s5 + $0x20] sm:$0xff]  ;;  %v452_v41 = vld [vmem:[%s1210_s5 + $0x18] sm:$0xff]  ;;  %v451_v42 = vld [vmem:[%s1210_s5 + $0x10] sm:$0xff] }
  0x11   :  { %841 = vmatprep.mubr.msk.f32.mxu0 %vm55_vm0, %v32_v13  ;;  %871 = vmatprep.subr.mxu1 %v274_v18  ;;  %v1159_v43 = vld [vmem:[%s1207_s2] ss:$0 sm:$0xff] }
  0x12   :  { %872 = vmatpush3.msra.mxu1 %v274_v18  ;;  %915 = vmatprep.subr.mxu0 %v456_v37 }
  0x13   :  { %873 = vmatprep.subr.mxu1 %v273_v20  ;;  %916 = vmatpush3.msra.mxu0 %v456_v37 }
  0x14   :  { %842 = vmatmul.mubr.msk.f32.gmra.mxu0 %vm55_vm0, %v33_v15  ;;  %874 = vmatpush3.msra.mxu1 %v273_v20 }
  0x15   :  { %844 = vmatprep.mubr.msk.f32.mxu0 %vm55_vm0, %v34_v17  ;;  %875 = vmatprep.subr.mxu1 %v272_v22 }
  0x16   :  { %876 = vmatpush3.msra.mxu1 %v272_v22  ;;  %917 = vmatprep.subr.mxu0 %v455_v38 }
  0x17   :  { %877 = vmatprep.subr.mxu1 %v271_v24  ;;  %918 = vmatpush3.msra.mxu0 %v455_v38 }
  0x18   :  { %845 = vmatmul.mubr.msk.f32.gmra.mxu0 %vm55_vm0, %v35_v19  ;;  %878 = vmatpush3.msra.mxu1 %v271_v24 }
  0x19   :  { %847 = vmatprep.mubr.msk.f32.mxu0 %vm55_vm0, %v36_v21  ;;  %879 = vmatprep.subr.mxu1 %v270_v26 }
  0x1a   :  { %880 = vmatpush3.msra.mxu1 %v270_v26  ;;  %919 = vmatprep.subr.mxu0 %v454_v39 }
  0x1b   :  { %881 = vmatprep.subr.mxu1 %v269_v28  ;;  %920 = vmatpush3.msra.mxu0 %v454_v39 }
  0x1c   :  { %848 = vmatmul.mubr.msk.f32.gmra.mxu0 %vm55_vm0, %v37_v23  ;;  %882 = vmatpush3.msra.mxu1 %v269_v28  ;;  %v450_v28 = vld [vmem:[%s1210_s5 + $0x8] sm:$0xff] }
  0x1d   :  { %850 = vmatprep.mubr.msk.f32.mxu0 %vm55_vm0, %v38_v25  ;;  %883 = vmatprep.subr.mxu1 %v268_v33 }
  0x1e   :  { %884 = vmatpush3.msra.mxu1 %v268_v33  ;;  %921 = vmatprep.subr.mxu0 %v453_v40 }
  0x1f   :  { %885 = vmatprep.subr.mxu1 %v267_v34  ;;  %922 = vmatpush3.msra.mxu0 %v453_v40 }
  0x20   :  { %851 = vmatmul.mubr.msk.f32.gmra.mxu0 %vm55_vm0, %v39_v27  ;;  %886 = vmatpush3.msra.mxu1 %v267_v34 }
  0x21   :  { %853 = vmatprep.mubr.msk.f32.mxu0 %vm55_vm0, %v40_v29  ;;  %887 = vmatprep.subr.mxu1 %v266_v35  ;;  %v449_v29 = vld [vmem:[%s1210_s5] sm:$0xff] }
  0x22   :  { %888 = vmatpush3.msra.mxu1 %v266_v35  ;;  %923 = vmatprep.subr.mxu0 %v452_v41 }
  0x23   :  { %889 = vmatprep.subr.mxu1 %v265_v36  ;;  %924 = vmatpush3.msra.mxu0 %v452_v41 }
  0x24   :  { %854 = vmatmul.mubr.msk.f32.gmra.mxu0 %vm55_vm0, %v41_v30  ;;  %890 = vmatpush3.msra.mxu1 %v265_v36  ;;  %v733_v30 = vld [vmem:[%s1209_s4] ss:$0 sm:$0xff] }
  0x25   :  { %856 = vmatprep.mubr.msk.f32.mxu0 %vm55_vm0, %v42_v31  ;;  %955 = vmatprep.subr.mxu1 %v456_v37 }
  0x26   :  { %925 = vmatprep.subr.mxu0 %v451_v42 }
  0x27   :  { %926 = vmatpush3.msra.mxu0 %v451_v42 }
  0x28   :  { %857 = vmatmul.mubr.msk.f32.gmra.mxu0 %vm55_vm0, %v43_v32  ;;  %927 = vmatprep.subr.mxu0 %v450_v28 }
  0x29   :  { %928 = vmatpush3.msra.mxu0 %v450_v28 }
  0x2a   :  { %929 = vmatprep.subr.mxu0 %v449_v29 }
  0x2b   :  { %930 = vmatpush3.msra.mxu0 %v449_v29 }
  0xcc   :  { %v837_v44 = vpop.f32.mrf.mxu0 }
  0xcd   :  { %v176_v45 = vadd.f32 %v837_v44, %v1159_v43 }
  0xce   :  { %v170_v46 = vpop.f32.mrf.mxu0 }
  0xcf   :  { %v171_v47 = vadd.f32 %v1159_v43, %v170_v46  ;;  %v250_v50 = vmax.f32 %v176_v45, 0.0 }
  0xd0   :  { %v840_v48 = vpop.f32.mrf.mxu0 }
  0xd1   :  { %v249_v49 = vmax.f32 %v171_v47, 0.0  ;;  %v186_v51 = vadd.f32 %v840_v48, %v1159_v43 }
  0xd2   :  { %v180_v52 = vpop.f32.mrf.mxu0 }
  0xd3   :  { %v181_v53 = vadd.f32 %v1159_v43, %v180_v52  ;;  %891 = vmatprep.mubr.f32.mxu1 %v249_v49  ;;  %v252_v56 = vmax.f32 %v186_v51, 0.0 }
  0xd4   :  { %v843_v54 = vpop.f32.mrf.mxu0  ;;  %892 = vmatmul.mubr.f32.vlgmr.msra.gmra.mxu1 %v250_v50 }
  0xd5   :  { %v251_v55 = vmax.f32 %v181_v53, 0.0  ;;  %963 = vmatpush3.msra.mxu1 %v456_v37  ;;  %v196_v57 = vadd.f32 %v843_v54, %v1159_v43 }
  0xd6   :  { %v190_v58 = vpop.f32.mrf.mxu0  ;;  %956 = vmatprep.subr.mxu1 %v455_v38 }
  0xd7   :  { %v191_v59 = vadd.f32 %v1159_v43, %v190_v58  ;;  %894 = vmatprep.mubr.f32.mxu1 %v251_v55  ;;  %964 = vmatpush3.msra.mxu1 %v455_v38  ;;  %v254_v62 = vmax.f32 %v196_v57, 0.0 }
  0xd8   :  { %v846_v60 = vpop.f32.mrf.mxu0  ;;  %895 = vmatmul.mubr.f32.gmra.mxu1 %v252_v56  ;;  %957 = vmatprep.subr.mxu1 %v454_v39 }
  0xd9   :  { %v253_v61 = vmax.f32 %v191_v59, 0.0  ;;  %965 = vmatpush3.msra.mxu1 %v454_v39  ;;  %v206_v63 = vadd.f32 %v846_v60, %v1159_v43 }
  0xda   :  { %v200_v0 = vpop.f32.mrf.mxu0  ;;  %958 = vmatprep.subr.mxu1 %v453_v40 }
  0xdb   :  { %v201_v1 = vadd.f32 %v1159_v43, %v200_v0  ;;  %897 = vmatprep.mubr.f32.mxu1 %v253_v61  ;;  %966 = vmatpush3.msra.mxu1 %v453_v40  ;;  %v256_v4 = vmax.f32 %v206_v63, 0.0 }
  0xdc   :  { %v849_v2 = vpop.f32.mrf.mxu0  ;;  %898 = vmatmul.mubr.f32.gmra.mxu1 %v254_v62  ;;  %959 = vmatprep.subr.mxu1 %v452_v41 }
  0xdd   :  { %v255_v3 = vmax.f32 %v201_v1, 0.0  ;;  %967 = vmatpush3.msra.mxu1 %v452_v41  ;;  %v216_v5 = vadd.f32 %v849_v2, %v1159_v43 }
  0xde   :  { %v210_v6 = vpop.f32.mrf.mxu0  ;;  %960 = vmatprep.subr.mxu1 %v451_v42 }
  0xdf   :  { %v211_v7 = vadd.f32 %v1159_v43, %v210_v6  ;;  %900 = vmatprep.mubr.f32.mxu1 %v255_v3  ;;  %968 = vmatpush3.msra.mxu1 %v451_v42  ;;  %v258_v10 = vmax.f32 %v216_v5, 0.0 }
  0xe0   :  { %v852_v8 = vpop.f32.mrf.mxu0  ;;  %901 = vmatmul.mubr.f32.gmra.mxu1 %v256_v4  ;;  %961 = vmatprep.subr.mxu1 %v450_v28 }
  0xe1   :  { %v257_v9 = vmax.f32 %v211_v7, 0.0  ;;  %v226_v11 = vadd.f32 %v852_v8, %v1159_v43  ;;  %969 = vmatpush3.msra.mxu1 %v450_v28 }
  0xe2   :  { %v220_v12 = vpop.f32.mrf.mxu0  ;;  %962 = vmatprep.subr.mxu1 %v449_v29 }
  0xe3   :  { %v221_v13 = vadd.f32 %v1159_v43, %v220_v12  ;;  %903 = vmatprep.mubr.f32.mxu1 %v257_v9  ;;  %v260_v16 = vmax.f32 %v226_v11, 0.0  ;;  %970 = vmatpush3.msra.mxu1 %v449_v29 }
  0xe4   :  { %v855_v14 = vpop.f32.mrf.mxu0  ;;  %904 = vmatmul.mubr.f32.gmra.mxu1 %v258_v10 }
  0xe5   :  { %v259_v15 = vmax.f32 %v221_v13, 0.0  ;;  %v236_v17 = vadd.f32 %v855_v14, %v1159_v43 }
  0xe6   :  { %v230_v18 = vpop.f32.mrf.mxu0 }
  0xe7   :  { %v231_v19 = vadd.f32 %v1159_v43, %v230_v18  ;;  %906 = vmatprep.mubr.f32.mxu1 %v259_v15  ;;  %v262_v22 = vmax.f32 %v236_v17, 0.0  ;;  %v734_v15 = vld [vmem:[#allocation2] ss:$0 sm:$0xff] }
  0xe8   :  { %v858_v20 = vpop.f32.mrf.mxu0  ;;  %907 = vmatmul.mubr.f32.gmra.mxu1 %v260_v16 }
  0xe9   :  { %v261_v21 = vmax.f32 %v231_v19, 0.0  ;;  %v246_v23 = vadd.f32 %v858_v20, %v1159_v43 }
  0xea   :  { %v240_v24 = vpop.f32.mrf.mxu0 }
  0xeb   :  { %v241_v25 = vadd.f32 %v1159_v43, %v240_v24  ;;  %909 = vmatprep.mubr.f32.mxu1 %v261_v21  ;;  %v264_v27 = vmax.f32 %v246_v23, 0.0 }
  0xec   :  { %910 = vmatmul.mubr.f32.gmra.mxu1 %v262_v22 }
  0xed   :  { %v263_v26 = vmax.f32 %v241_v25, 0.0 }
  0xef   :  { %912 = vmatprep.mubr.f32.mxu1 %v263_v26 }
  0xf0   :  { %913 = vmatmul.mubr.f32.gmra.mxu1 %v264_v27 }
 0x194   :  { %v893_v31 = vpop.f32.mrf.mxu1 }
 0x195   :  { %v360_v32 = vadd.f32 %v893_v31, %v733_v30 }
 0x196   :  { %v354_v33 = vpop.f32.mrf.mxu1 }
 0x197   :  { %v355_v34 = vadd.f32 %v733_v30, %v354_v33  ;;  %v434_v37 = vmax.f32 %v360_v32, 0.0 }
 0x198   :  { %v896_v35 = vpop.f32.mrf.mxu1 }
 0x199   :  { %v433_v36 = vmax.f32 %v355_v34, 0.0  ;;  %v370_v38 = vadd.f32 %v896_v35, %v733_v30 }
 0x19a   :  { %v364_v39 = vpop.f32.mrf.mxu1 }
 0x19b   :  { %v365_v40 = vadd.f32 %v733_v30, %v364_v39  ;;  %931 = vmatprep.mubr.msk.f32.mxu0 %vm464_vm1, %v433_v36  ;;  %v436_v43 = vmax.f32 %v370_v38, 0.0 }
 0x19c   :  { %v899_v41 = vpop.f32.mrf.mxu1  ;;  %932 = vmatmul.mubr.msk.f32.vlgmr.msra.gmra.mxu0 %vm464_vm1, %v434_v37 }
 0x19d   :  { %v435_v42 = vmax.f32 %v365_v40, 0.0  ;;  %v380_v44 = vadd.f32 %v899_v41, %v733_v30 }
 0x19e   :  { %v374_v45 = vpop.f32.mrf.mxu1 }
 0x19f   :  { %v375_v46 = vadd.f32 %v733_v30, %v374_v45  ;;  %934 = vmatprep.mubr.msk.f32.mxu0 %vm464_vm1, %v435_v42  ;;  %v438_v49 = vmax.f32 %v380_v44, 0.0 }
 0x1a0   :  { %v902_v47 = vpop.f32.mrf.mxu1  ;;  %935 = vmatmul.mubr.msk.f32.gmra.mxu0 %vm464_vm1, %v436_v43 }
 0x1a1   :  { %v437_v48 = vmax.f32 %v375_v46, 0.0  ;;  %v390_v50 = vadd.f32 %v902_v47, %v733_v30 }
 0x1a2   :  { %v384_v51 = vpop.f32.mrf.mxu1 }
 0x1a3   :  { %v385_v52 = vadd.f32 %v733_v30, %v384_v51  ;;  %937 = vmatprep.mubr.msk.f32.mxu0 %vm464_vm1, %v437_v48  ;;  %v440_v55 = vmax.f32 %v390_v50, 0.0 }
 0x1a4   :  { %v905_v53 = vpop.f32.mrf.mxu1  ;;  %938 = vmatmul.mubr.msk.f32.gmra.mxu0 %vm464_vm1, %v438_v49 }
 0x1a5   :  { %v439_v54 = vmax.f32 %v385_v52, 0.0  ;;  %v400_v56 = vadd.f32 %v905_v53, %v733_v30 }
 0x1a6   :  { %v394_v57 = vpop.f32.mrf.mxu1 }
 0x1a7   :  { %v395_v58 = vadd.f32 %v733_v30, %v394_v57  ;;  %940 = vmatprep.mubr.msk.f32.mxu0 %vm464_vm1, %v439_v54  ;;  %v442_v61 = vmax.f32 %v400_v56, 0.0 }
 0x1a8   :  { %v908_v59 = vpop.f32.mrf.mxu1  ;;  %941 = vmatmul.mubr.msk.f32.gmra.mxu0 %vm464_vm1, %v440_v55 }
 0x1a9   :  { %v441_v60 = vmax.f32 %v395_v58, 0.0  ;;  %v410_v62 = vadd.f32 %v908_v59, %v733_v30 }
 0x1aa   :  { %v404_v63 = vpop.f32.mrf.mxu1 }
 0x1ab   :  { %v405_v0 = vadd.f32 %v733_v30, %v404_v63  ;;  %943 = vmatprep.mubr.msk.f32.mxu0 %vm464_vm1, %v441_v60  ;;  %v444_v3 = vmax.f32 %v410_v62, 0.0 }
 0x1ac   :  { %v911_v1 = vpop.f32.mrf.mxu1  ;;  %944 = vmatmul.mubr.msk.f32.gmra.mxu0 %vm464_vm1, %v442_v61 }
 0x1ad   :  { %v443_v2 = vmax.f32 %v405_v0, 0.0  ;;  %v420_v4 = vadd.f32 %v911_v1, %v733_v30 }
 0x1ae   :  { %v414_v5 = vpop.f32.mrf.mxu1 }
 0x1af   :  { %v415_v6 = vadd.f32 %v733_v30, %v414_v5  ;;  %946 = vmatprep.mubr.msk.f32.mxu0 %vm464_vm1, %v443_v2  ;;  %v446_v9 = vmax.f32 %v420_v4, 0.0 }
 0x1b0   :  { %v914_v7 = vpop.f32.mrf.mxu1  ;;  %947 = vmatmul.mubr.msk.f32.gmra.mxu0 %vm464_vm1, %v444_v3 }
 0x1b1   :  { %v445_v8 = vmax.f32 %v415_v6, 0.0  ;;  %v430_v10 = vadd.f32 %v914_v7, %v733_v30 }
 0x1b2   :  { %v424_v11 = vpop.f32.mrf.mxu1 }
 0x1b3   :  { %v425_v12 = vadd.f32 %v733_v30, %v424_v11  ;;  %949 = vmatprep.mubr.msk.f32.mxu0 %vm464_vm1, %v445_v8  ;;  %v448_v14 = vmax.f32 %v430_v10, 0.0 }
 0x1b4   :  { %950 = vmatmul.mubr.msk.f32.gmra.mxu0 %vm464_vm1, %v446_v9 }
 0x1b5   :  { %v447_v13 = vmax.f32 %v425_v12, 0.0 }
 0x1b7   :  { %952 = vmatprep.mubr.msk.f32.mxu1 %vm464_vm1, %v447_v13 }
 0x1b8   :  { %953 = vmatmul.mubr.msk.f32.vlgmr.msra.gmra.mxu1 %vm464_vm1, %v448_v14 }
 0x25c   :  { %v933_v16 = vpop.f32.mrf.mxu0 }
 0x25e   :  { %v579_v17 = vpop.f32.mrf.mxu0 }
 0x25f   :  { %v580_v18 = vadd.f32 %v734_v15, %v579_v17 }
 0x260   :  { %v936_v19 = vpop.f32.mrf.mxu0 }
 0x261   :  { %659 = vst.msk [vmem:[#allocation3] sm:$0xff] %vm658_vm2, %v580_v18 }
 0x262   :  { %v589_v20 = vpop.f32.mrf.mxu0 }
 0x264   :  { %v939_v21 = vpop.f32.mrf.mxu0 }
 0x266   :  { %v599_v22 = vpop.f32.mrf.mxu0 }
 0x268   :  { %v705_v23 = vld [vmem:[#allocation3] sm:$0xff]  ;;  %v942_v24 = vpop.f32.mrf.mxu0 }
 0x269   :  { %706 = vst [vmem:[%s1212_s7] sm:$0xff] %v705_v23 }
 0x26a   :  { %v609_v25 = vpop.f32.mrf.mxu0 }
 0x26c   :  { %v945_v26 = vpop.f32.mrf.mxu0 }
 0x26e   :  { %v619_v27 = vpop.f32.mrf.mxu0 }
 0x270   :  { %v948_v28 = vpop.f32.mrf.mxu0 }
 0x272   :  { %v629_v29 = vpop.f32.mrf.mxu0 }
 0x274   :  { %v951_v30 = vpop.f32.mrf.mxu0 }
 0x276   :  { %v639_v31 = vpop.f32.mrf.mxu0 }
 0x278   :  { %v954_v32 = vpop.f32.mrf.mxu1 }
 0x27a   :  { %v649_v33 = vpop.f32.mrf.mxu1 }

</bundles_post_ra>
